<compile_context>
chip_gen: v5e
topology: v5e:2x2
jax: 0.10.0
libtpu: 0.0.40
codegen_flags: <defaults>
</compile_context>

<pallas_src>
import jax
import jax.numpy as jnp
from jax.experimental import pallas as pl
from jax.experimental.pallas import tpu as pltpu


def _round_up(x, m):
    return (x + m - 1) // m * m


def _cdiv(a, b):
    return -(-a // b)


def _lm_criterion_kernel(inp_ref, tgt_ref, msk_ref, out_ref, iota_ref, gath_ref):
    k = pl.program_id(1)
    tv = inp_ref.shape[1]

    @pl.when(k == 0)
    def _init():
        # Column-id table + per-token accumulator, rebuilt once per token tile
        # (not once per vocab step).
        iota_ref[...] = jax.lax.broadcasted_iota(jnp.int32, iota_ref.shape, 1)
        gath_ref[...] = jnp.zeros_like(gath_ref)

    logp = inp_ref[...]                                # (tt, tv), native dtype
    # Fold the vocab-tile base offset into the small (tt, 1) target instead of
    # offsetting the full (tt, tv) column-id table.
    tgt_local = tgt_ref[...] - k * tv                  # (tt, 1) int32
    sel = jnp.where(iota_ref[...] == tgt_local, logp, jnp.zeros_like(logp))
    # Each row has at most one nonzero -> the lane-sum is exact in any dtype;
    # only the tiny (tt, 1) result is upcast; cross-step accumulation is f32.
    gathered = jnp.sum(sel, axis=1, keepdims=True).astype(jnp.float32)
    gath_ref[...] = gath_ref[...] + gathered

    @pl.when(k == pl.num_programs(1) - 1)
    def _finalize():
        partial = jnp.sum(-gath_ref[...] * msk_ref[...])        # scalar
        out_ref[...] = jnp.full(out_ref.shape, partial, dtype=jnp.float32)


def language_model_criterion(inp, target, mask, *,
                             max_token_tile=256, max_vocab_tile=8192):
    """Pallas implementation of LanguageModelCriterion.forward."""
    B, T, V = inp.shape

    # Truncate exactly like the PyTorch module.
    target = target[:, :T].astype(jnp.int32)
    mask = mask[:, :T].astype(jnp.float32)

    # Denominator is a cheap reduction over the tiny mask -> wrapper glue.
    denom = jnp.sum(mask)

    N = B * T
    inp2 = inp.reshape(N, V)   # free contiguous reshape; keeps producer dtype.

    # Token tile: multiple of 8 (sublanes).  Clamp so the parallel axis has at
    # least two tiles whenever possible (both v7x TensorCores get work).
    tt = min(max_token_tile, _round_up(N, 8))
    if _cdiv(N, tt) < 2:
        tt = _round_up(_cdiv(N, 2), 8)
    n_tt = _cdiv(N, tt)

    # Vocab tile: multiple of 128 (lanes); full V when it fits the cap.
    tv = min(max_vocab_tile, _round_up(V, 128))
    n_kv = _cdiv(V, tv)
    n_pad = n_tt * tt

    # target/mask are tiny: pad to the token-tile grid.  Padded rows get
    # target = -1 (matches no vocab column) and mask = 0 (no contribution).
    tgt2 = jnp.pad(target.reshape(N, 1), ((0, n_pad - N), (0, 0)),
                   constant_values=-1)
    msk2 = jnp.pad(mask.reshape(N, 1), ((0, n_pad - N), (0, 0)),
                   constant_values=0.0)

    itemsize = jnp.dtype(inp.dtype).itemsize
    cost = pl.CostEstimate(
        flops=2 * N * V,                       # compare + select per element
        transcendentals=0,
        bytes_accessed=N * V * itemsize + n_pad * 8 + n_tt * 128 * 4,
    )

    partials = pl.pallas_call(
        _lm_criterion_kernel,
        out_shape=jax.ShapeDtypeStruct((n_tt, 1, 128), jnp.float32),
        grid_spec=pltpu.PrefetchScalarGridSpec(
            num_scalar_prefetch=0,
            grid=(n_tt, n_kv),
            in_specs=[
                pl.BlockSpec((tt, tv), lambda i, k: (i, k)),
                pl.BlockSpec((tt, 1), lambda i, k: (i, 0)),
                pl.BlockSpec((tt, 1), lambda i, k: (i, 0)),
            ],
            out_specs=pl.BlockSpec((1, 1, 128), lambda i, k: (i, 0, 0)),
            scratch_shapes=[
                pltpu.VMEM((tt, tv), jnp.int32),     # column-id table
                pltpu.VMEM((tt, 1), jnp.float32),    # per-token gathered acc
            ],
        ),
        compiler_params=pltpu.CompilerParams(
            # token tiles are independent -> megacore-parallel (v7x 2 TCs);
            # vocab axis is the reduction -> 'arbitrary' and last.
            dimension_semantics=("parallel", "arbitrary"),
            # 2 x 8 MiB input buffers + <= 8 MiB iota scratch + small; leaves
            # headroom below v7x's 64 MiB physical VMEM and overrides v5e's
            # 16 MiB scoped default.
            vmem_limit_bytes=48 * 1024 * 1024,
        ),
        cost_estimate=cost,
    )(inp2, tgt2, msk2)

    numerator = jnp.sum(partials[:, 0, 0])
    return numerator / denom


def _reference(inp, target, mask):
    T = inp.shape[1]
    target = target[:, :T].astype(jnp.int32)
    mask = mask[:, :T].astype(jnp.float32)
    gathered = jnp.take_along_axis(inp.astype(jnp.float32),
                                   target[:, :, None], axis=2)[:, :, 0]
    return jnp.sum(-gathered * mask) / jnp.sum(mask)


def _make_inputs(key, B, T, T_tgt, V):
    k1, k2, k3 = jax.random.split(key, 3)
    logits = jax.random.normal(k1, (B, T, V), dtype=jnp.float32)
    inp = jax.nn.log_softmax(logits, axis=-1)
    target = jax.random.randint(k2, (B, T_tgt), 0, V, dtype=jnp.int32)
    mask = (jax.random.uniform(k3, (B, T_tgt)) > 0.3).astype(jnp.float32)
    mask = mask.at[0, 0].set(1.0)   # ensure mask not all-zero
    return inp, target, mask


if __name__ == "__main__":
    key = jax.random.PRNGKey(0)
    key1, key2, key3 = jax.random.split(key, 3)

    # Case 1: small shapes, single vocab tile, token axis clamped to 2 tiles
    # (target/mask longer than T to exercise the truncation in the wrapper).
    inp, target, mask = _make_inputs(key1, B=2, T=8, T_tgt=10, V=32)
    loss = jax.block_until_ready(language_model_criterion(inp, target, mask))
    ref = _reference(inp, target, mask)
    assert jnp.allclose(loss, ref, atol=1e-5, rtol=1e-5), (loss, ref)

    # Case 2: force a multi-tile grid with ragged token and vocab edges to
    # exercise the per-tile scratch accumulation / padded-block handling.
    inp2, target2, mask2 = _make_inputs(key2, B=2, T=13, T_tgt=15, V=300)
    loss2 = jax.block_until_ready(
        language_model_criterion(inp2, target2, mask2,
                                 max_token_tile=8, max_vocab_tile=128))
    ref2 = _reference(inp2, target2, mask2)
    assert jnp.allclose(loss2, ref2, atol=1e-5, rtol=1e-5), (loss2, ref2)

    # Case 3: bf16 input exercises the native-dtype select / lane-sum path
    # (upcast to f32 only on the (tt,1) gathered column).
    inp3, target3, mask3 = _make_inputs(key3, B=2, T=12, T_tgt=12, V=160)
    inp3 = inp3.astype(jnp.bfloat16)
    loss3 = jax.block_until_ready(language_model_criterion(inp3, target3, mask3))
    ref3 = _reference(inp3, target3, mask3)
    assert jnp.allclose(loss3, ref3, atol=1e-4, rtol=1e-4), (loss3, ref3)

    print("KERNEL_OK")
</pallas_src>

<mosaic_0001>
module attributes {stable_mosaic.version = 11 : i64} {
  func.func @_lm_criterion_kernel(%arg0: i32, %arg1: i32, %arg2: memref<8x128xf32, #tpu.memory_space<vmem>>, %arg3: memref<8x1xi32, #tpu.memory_space<vmem>>, %arg4: memref<8x1xf32, #tpu.memory_space<vmem>>, %arg5: memref<1x1x128xf32, #tpu.memory_space<vmem>>, %arg6: memref<8x128xi32, #tpu.memory_space<vmem>>, %arg7: memref<8x1xf32, #tpu.memory_space<vmem>>) attributes {dimension_semantics = [#tpu.dimension_semantics<parallel>, #tpu.dimension_semantics<arbitrary>], iteration_bounds = array<i64: 2, 1>, scalar_prefetch = 0 : i64, scratch_operands = 2 : i64, tpu.core_type = #tpu.core_type<tc>, window_params = [{transform_indices = @transform_0, window_bounds = array<i64: 8, 128>}, {transform_indices = @transform_1, window_bounds = array<i64: 8, 1>}, {transform_indices = @transform_2, window_bounds = array<i64: 8, 1>}, {transform_indices = @transform_3, window_bounds = array<i64: 1, 1, 128>}]} {
    %c0_i32 = arith.constant 0 : i32
    %0 = arith.cmpi eq, %arg1, %c0_i32 : i32
    %1 = arith.extui %0 : i1 to i32
    %c0_i32_0 = arith.constant 0 : i32
    %2 = arith.cmpi ne, %1, %c0_i32_0 : i32
    scf.if %2 {
      %21 = tpu.iota {dimensions = array<i32: 1>} : vector<8x128xi32>
      %c0_13 = arith.constant 0 : index
      %c0_14 = arith.constant 0 : index
      %22 = vector.load %arg6[%c0_13, %c0_14] : memref<8x128xi32, #tpu.memory_space<vmem>>, vector<8x128xi32>
      tpu.vector_store %arg6[%c0_13, %c0_14], %21 {strides = array<i32>} : memref<8x128xi32, #tpu.memory_space<vmem>>, vector<8x128xi32>,
      %cst_15 = arith.constant 0.000000e+00 : f32
      %23 = vector.broadcast %cst_15 : f32 to vector<8x1xf32>
      %c0_16 = arith.constant 0 : index
      %c0_17 = arith.constant 0 : index
      %24 = vector.load %arg7[%c0_16, %c0_17] : memref<8x1xf32, #tpu.memory_space<vmem>>, vector<8x1xf32>
      tpu.vector_store %arg7[%c0_16, %c0_17], %23 {strides = array<i32>} : memref<8x1xf32, #tpu.memory_space<vmem>>, vector<8x1xf32>,
    } else {
    }
    %c0 = arith.constant 0 : index
    %c0_1 = arith.constant 0 : index
    %3 = vector.load %arg2[%c0, %c0_1] : memref<8x128xf32, #tpu.memory_space<vmem>>, vector<8x128xf32>
    %c0_2 = arith.constant 0 : index
    %c0_3 = arith.constant 0 : index
    %4 = vector.load %arg3[%c0_2, %c0_3] : memref<8x1xi32, #tpu.memory_space<vmem>>, vector<8x1xi32>
    %c128_i32 = arith.constant 128 : i32
    %5 = arith.muli %arg1, %c128_i32 : i32
    %6 = vector.broadcast %5 : i32 to vector<8x1xi32>
    %7 = arith.subi %4, %6 : vector<8x1xi32>
    %c0_4 = arith.constant 0 : index
    %c0_5 = arith.constant 0 : index
    %8 = vector.load %arg6[%c0_4, %c0_5] : memref<8x128xi32, #tpu.memory_space<vmem>>, vector<8x128xi32>
    %9 = vector.broadcast %7 : vector<8x1xi32> to vector<8x128xi32>
    %10 = arith.cmpi eq, %8, %9 : vector<8x128xi32>
    %cst = arith.constant 0.000000e+00 : f32
    %11 = vector.broadcast %cst : f32 to vector<8x128xf32>
    %12 = arith.select %10, %3, %11 : vector<8x128xi1>, vector<8x128xf32>
    %cst_6 = arith.constant dense<0.000000e+00> : vector<8xf32>
    %13 = vector.multi_reduction <add>, %12, %cst_6 [1] : vector<8x128xf32> to vector<8xf32>
    %14 = vector.shape_cast %13 : vector<8xf32> to vector<8x1xf32>
    %c0_7 = arith.constant 0 : index
    %c0_8 = arith.constant 0 : index
    %15 = vector.load %arg7[%c0_7, %c0_8] : memref<8x1xf32, #tpu.memory_space<vmem>>, vector<8x1xf32>
    %16 = arith.addf %15, %14 : vector<8x1xf32>
    %c0_9 = arith.constant 0 : index
    %c0_10 = arith.constant 0 : index
    %17 = vector.load %arg7[%c0_9, %c0_10] : memref<8x1xf32, #tpu.memory_space<vmem>>, vector<8x1xf32>
    tpu.vector_store %arg7[%c0_9, %c0_10], %16 {strides = array<i32>} : memref<8x1xf32, #tpu.memory_space<vmem>>, vector<8x1xf32>,
    %c0_i32_11 = arith.constant 0 : i32
    %18 = arith.cmpi eq, %arg1, %c0_i32_11 : i32
    %19 = arith.extui %18 : i1 to i32
    %c0_i32_12 = arith.constant 0 : i32
    %20 = arith.cmpi ne, %19, %c0_i32_12 : i32
    scf.if %20 {
      %c0_13 = arith.constant 0 : index
      %c0_14 = arith.constant 0 : index
      %21 = vector.load %arg7[%c0_13, %c0_14] : memref<8x1xf32, #tpu.memory_space<vmem>>, vector<8x1xf32>
      %cst_15 = arith.constant 0.000000e+00 : f32
      %22 = vector.broadcast %cst_15 : f32 to vector<8x1xf32>
      %23 = arith.subf %22, %21 : vector<8x1xf32>
      %c0_16 = arith.constant 0 : index
      %c0_17 = arith.constant 0 : index
      %24 = vector.load %arg4[%c0_16, %c0_17] : memref<8x1xf32, #tpu.memory_space<vmem>>, vector<8x1xf32>
      %25 = arith.mulf %23, %24 : vector<8x1xf32>
      %26 = vector.shape_cast %25 : vector<8x1xf32> to vector<1x8x1xf32>
      %cst_18 = arith.constant dense<0.000000e+00> : vector<1xf32>
      %27 = vector.multi_reduction <add>, %26, %cst_18 [1, 2] : vector<1x8x1xf32> to vector<1xf32>
      %28 = vector.shape_cast %27 : vector<1xf32> to vector<1x1x1xf32>
      %29 = vector.extract %28[0, 0, 0] : f32 from vector<1x1x1xf32>
      %30 = vector.broadcast %29 : f32 to vector<1x1x128xf32>
      %c0_19 = arith.constant 0 : index
      %c0_20 = arith.constant 0 : index
      %c0_21 = arith.constant 0 : index
      %31 = vector.load %arg5[%c0_19, %c0_20, %c0_21] : memref<1x1x128xf32, #tpu.memory_space<vmem>>, vector<1x1x128xf32>
      tpu.vector_store %arg5[%c0_19, %c0_20, %c0_21], %30 {strides = array<i32>} : memref<1x1x128xf32, #tpu.memory_space<vmem>>, vector<1x1x128xf32>,
    } else {
    }
    return
  }
  func.func @transform_0(%arg0: i32, %arg1: i32) -> (i32, i32) {
    %c0_i32 = arith.constant 0 : i32
    return %arg0, %arg1 : i32, i32
  }
  func.func @transform_1(%arg0: i32, %arg1: i32) -> (i32, i32) {
    %c0_i32 = arith.constant 0 : i32
    %c0_i32_0 = arith.constant 0 : i32
    return %arg0, %c0_i32 : i32, i32
  }
  func.func @transform_2(%arg0: i32, %arg1: i32) -> (i32, i32) {
    %c0_i32 = arith.constant 0 : i32
    %c0_i32_0 = arith.constant 0 : i32
    return %arg0, %c0_i32 : i32, i32
  }
  func.func @transform_3(%arg0: i32, %arg1: i32) -> (i32, i32, i32) {
    %c0_i32 = arith.constant 0 : i32
    %c0_i32_0 = arith.constant 0 : i32
    %c0_i32_1 = arith.constant 0 : i32
    return %arg0, %c0_i32, %c0_i32_0 : i32, i32, i32
  }
}

</mosaic_0001>

<bundles_post_ra>
// kernel: tpu_custom_call.1
= control target key start
LH: loop header
LB: loop body
LE: loop exit
PB: predicated region body
PF: predicated region fallthrough
CT: control target
= control target key end

     0   :  { %8 = vsyncpa [#allocation5], 0  ;;  %s648_s0 = inlined_call_operand.vmem [shape: f32[16,32], index: 0, kind: input, shape index: {}]   ;;  %s649_s1 = inlined_call_operand.vmem [shape: s32[16,1], index: 1, kind: input, shape index: {}]   ;;  %s650_s2 = inlined_call_operand.vmem [shape: f32[16,1], index: 2, kind: input, shape index: {}]   ;;  %s651_s3 = inlined_call_operand.hbm [shape: f32[2,1,128], index: 3, kind: output, shape index: {}]  }
   0x1   :  { %10 = vsyncpa [#allocation5 + $0x1], 0  ;;  %s542_s12 = smov 0   ;;  %s544_s13 = smov 0  }
   0x2   :  { %s546_s14 = smov 0   ;;  %s548_s15 = smov 0  }
   0x3   :  { %s550_s16 = smov 0   ;;  %s552_s17 = smov 0  }
   0x4 LB: > { %s370_s18 = sadd.s32 4294967295, %s518_s17   ;;  %s371_s19 = sadd.s32 4294967294, %s518_s17   ;;  %s518_s17 = sphi %s552_s17, %s16_s17   ;;  %s514_s16 = sphi %s550_s16, %s658_s16   ;;  %s510_s15 = sphi %s548_s15, %s657_s15   ;;  %s506_s14 = sphi %s546_s14, %s656_s14   ;;  %s502_s13 = sphi %s544_s13, %s655_s13   ;;  %s498_s12 = sphi %s542_s12, %s654_s12  }
   0x5   : > { %s28_s20 = sadd.s32 1, %s514_s16  ;;  %s115_s21 = sadd.s32 1, %s506_s14 }
   0x6   : > { %p30_p0 = scmp.ge.s32.totalorder %s28_s20, 2  ;;  %p125_p1 = scmp.ne.s32.totalorder %s506_s14, %s502_s13 }
   0x7   : > { %p126_p2 = scmp.eq.s32.totalorder %s370_s18, 1  ;;  %p131_p3 = scmp.ne.s32.totalorder %s502_s13, %s498_s12 }
   0x8   : > { %s660_s20 = smov (%p30_p0, %s28_s20), 0  ;;  %p132_p5 = scmp.eq.s32.totalorder %s371_s19, 1 }
   0x9   : > { %p582_p4 = por %p126_p2, %p125_p1  ;;  %s112_s23 = ssub.s32 %s514_s16, %s660_s20 }
   0xa   : > { %p374_p6 = scmp.ge.s32.totalorder %s518_s17, 1  ;;  %p113_p7 = scmp.eq.s32.totalorder %s112_s23, 0 }
   0xb   : > { %p589_p8 = por %p132_p5, %p131_p3  ;;  %p174_p9 = scmp.lt.s32.totalorder %s518_s17, 3 }
   0xc   : > { %s595_s25 = scalar_select %p113_p7, %s506_s14, %s115_s21  }
   0xd   : > { %p175_p10 = pnand %p374_p6, %p174_p9 }
   0xe   : > { %p207_p11 = scmp.lt.s32.totalorder (!%p175_p10), %s510_s15, 1  ;;  %s205_s10 = sand.u32 (!%p175_p10), 1, %s502_s13  }
   0xf   : > { %178 = sbr.rel (%p175_p10) target bundleno = 455 (0x1c7), region = 32  ;;  %s276_s19 = scalar_lea.hbm (!%p175_p10), %s651_s3, %s510_s15 }
  0x10   : > { %s206_s21 = scalar_lea.vmem (!%p175_p10), [#allocation4], %s205_s10  ;;  %s268_s28 = scalar_lea.sflag (!%p175_p10), [#allocation5], %s205_s10 }
  0x11   : > { %s278_s23 = sshll.u32 (!%p175_p10), %s206_s21, 4  ;;  %s279_s23 = int_to_ptr.vmem [resolvable:$true] %s278_s23 }
  0x14   : > { %v520_v0 = vmov 0   ;;  %s208_s26 = scalar_select %p207_p11, %s510_s15, 1  ;;  %vm229_vm0 = vcmask 7168   ;;  %v521_v2 = vmov 0.0   ;;  %v226_v3 = vlaneseq }
  0x15   : > { %439 = vset.pattern.permute.xlu0 %v520_v0  ;;  %230 = vst.msk [vmem:[#allocation3] sm:$0xff] %vm229_vm0, %v521_v2  ;;  %s460_s15 = scalar_lea.hbm %s651_s3, 2 }
  0x16   : > { %s375_s27 = sshll.u32 %s208_s26, 3  ;;  %v227_v4 = vand.u32 127, %v226_v3  ;;  %s280_s26 = sshll.u32 %s276_s19, 4  ;;  %s281_s26 = int_to_ptr.hbm [resolvable:$true] %s280_s26 }
  0x17   : > { %s217_s30 = scalar_lea.vmem %s649_s1, %s375_s27  ;;  %s213_s6 = scalar_lea.vmem %s648_s0, %s375_s27 }
  0x18   : > { %v232_v1 = vld [vmem:[%s217_s30] sm:$0xff]  ;;  %s221_s9 = scalar_lea.vmem %s650_s2, %s375_s27  ;;  %s454_s29 = sshra.s32 %s281_s26, 4  ;;  %s455_s29 = int_to_ptr.hbm [resolvable:$true] %s454_s29 }
  0x19   : > { %238 = vperm.xlu0 %439, %v232_v1   ;;  %v231_v5 = vld [vmem:[%s213_s6] sm:$0xff]  ;;  %s456_s30 = scalar_lea.hbm %s455_s29, 1  ;;  %p461_p1 = scmp.lt.s32.totalorder %s455_s29, %s651_s3 }
  0x1a   : > { %v253_v12 = vld [vmem:[%s221_s9] sm:$0xff]  ;;  %p457_p12 = scmp.ne.s32.totalorder %s455_s29, %s456_s30  ;;  %p462_p2 = scmp.lt.s32.totalorder %s460_s15, %s456_s30 }
  0x1c   : > { %v244_v8 = vld [vmem:[#allocation3] sm:$0xff]  ;;  %p458_p13 = pnand %p457_p12, %p582_p4  ;;  %p463_p3 = por %p462_p2, %p461_p1 }
  0x1e   : > { %p459_p0 = pneg %p458_p13 }
  0x20   : > { %p464_p5 = pnand %p463_p3, %p459_p0 }
  0x8b   : > { %v239_v6 = vpop.permute.xlu0 %238 }
  0x8c   : > { %vm240_vm1 = vcmp.eq.s32.totalorder %v227_v4, %v239_v6 }
  0x8d   : > { %v241_v7 = vsel %vm240_vm1, %v231_v5, 0.0 }
  0x8e   : > { %242 = vadd.xlane.f32.xlu0 %v241_v7 }
 0x101   : > { %v243_v9 = vpop.xlane.xlu0 %242 }
 0x102   : > { %v245_v10 = vadd.f32 %v244_v8, %v243_v9 }
 0x104   : > { %247 = vst.msk [vmem:[#allocation3] sm:$0xff] %vm229_vm0, %v245_v10 }
 0x10b   : > { %v251_v11 = vld [vmem:[#allocation3] sm:$0xff] }
 0x10c   : > { %v252_v13 = vsub.f32 0.0, %v251_v11 }
 0x10e   : > { %v254_v14 = vmul.f32 %v253_v12, %v252_v13 }
 0x110   : > { %v255_v15 = vsel %vm229_vm0, %v254_v14, 0.0 }
 0x111   : > { %256 = vadd.xlane.f32.xlu1 %v255_v15 }
 0x184   : > { %v257_v16 = vpop.xlane.xlu1 %256 }
 0x185   : > { %v258_v17 = vrot.slane %v257_v16, 4 }
 0x187   : > { %v259_v18 = vadd.f32 %v258_v17, %v257_v16 }
 0x189   : > { %v260_v19 = vrot.slane %v259_v18, 2 }
 0x18b   : > { %v261_v20 = vadd.f32 %v260_v19, %v259_v18 }
 0x18d   : > { %v262_v21 = vrot.slane %v261_v20, 1 }
 0x18f   : > { %v263_v22 = vadd.f32 %v262_v21, %v261_v20 }
 0x191   : > { %380 = vpush %v263_v22 }
 0x1c2   : > { %s381_s27 = spop %380 }
 0x1c3   : > { %v265_v23 = vstv %s381_s27 }
 0x1c4   : > { %266 = vst [vmem:[%s206_s21] sm:$0x1] %v265_v23 }
 0x1c5   : > { %467 = shalt.err (!%p464_p5)
}
 0x1c6   : > { %382 = dma.vmem_to_hbm [thread:$0]  (%p582_p4), %s279_s23, 16, %s281_s26, %s268_s28  }
 0x1c7 PF: > { %p388_p6 = scmp.ge.s32.totalorder %s518_s17, 2  ;;  %s292_s8 = sand.u32 1, %s498_s12  }
 0x1c8   : > { %s293_s9 = scalar_lea.sflag [#allocation5], %s292_s8 }
 0x1c9   : > { %p385_p7 = pnand %p388_p6, %p589_p8 }
 0x1cb   : > { %p386_p9 = pneg %p385_p7 }
 0x1cd   : > { %493 = dma.done.wait (%p386_p9), %s293_s9, 16  }
 0x1ce   : > { %495 = vsyncadd (%p386_p9), %s293_s9, 4294967280  ;;  %s16_s17 = sadd.s32 1, %s518_s17   ;;  %s654_s12 = smov %s502_s13 }
 0x1cf   : > { %p13_p10 = scmp.ge.s32.totalorder %s16_s17, 4   ;;  %s655_s13 = smov %s506_s14 }
 0x1d0   : > { %s656_s14 = smov %s595_s25  ;;  %s657_s15 = smov %s514_s16 }
 0x1d1   : > { %s658_s16 = smov %s660_s20  ;;  %15 = sbr.rel (!%p13_p10) target bundleno = 4 (0x4), region = 81 }
 0x1d6   :  { %298 = vsyncpa [#allocation5], 1 }
 0x1d7   :  { %300 = vsyncpa [#allocation5 + $0x1], 1 }

</bundles_post_ra>
